<compile_context>
chip_gen: v7x
topology: tpu7x:2x2x1
jax: 0.10.0
libtpu: 0.0.40
codegen_flags: <defaults>
</compile_context>

<pallas_src>
import jax
import jax.numpy as jnp
from jax.experimental import pallas as pl
from jax.experimental.pallas import tpu as pltpu

LANE = 128
TILE_BYTES = 4 * 1024 * 1024         # ~4 MiB per input block (perf review)
VMEM_LIMIT_BYTES = 40 * 1024 * 1024  # explicit; <= v7x physical 64 MiB
MAX_SPLITS = 2                       # leading "parallel" axis (v7x: 2 TCs)
MIN_PALLAS_BYTES = 1 * 1024 * 1024   # below this, plain jnp beats launch cost


def _round_down(x, m):
    return (x // m) * m


def _sublane_multiple(dtype):
    # Minimal second-minor multiple for the element width
    # (f32 -> 8, bf16 -> 16, int8/fp8 -> 32).
    return max(8, 32 // jnp.dtype(dtype).itemsize)


def _to_slab(a):
    """Flatten `a` to a lane-dense (rows, 128) slab.

    The reshape of a contiguous array whose size is a multiple of 128 is a
    free bitcast (the common case for NN tensors).
    """
    flat = a.reshape(-1)
    n = flat.shape[0]
    rows = pl.cdiv(n, LANE)
    if n != rows * LANE:
        # TODO(synk): lane-ragged inputs still take one zero-pad copy; since
        # both x and t are padded with zeros, |0-0|=0 contributes nothing.
        flat = jnp.pad(flat, (0, rows * LANE - n))
    return flat.reshape(rows, LANE)


def _make_abs_sum_kernel(tile_rows, tiles_per_split, num_tiles,
                         edge_valid_rows):
    """Kernel computing sum(|t - x|) tile-by-tile into an (8,128) accumulator.

    edge_valid_rows is None when every tile is a full block; otherwise it is
    the number of valid rows in the last (partial) tile.
    """
    sub_blocks = tile_rows // 8
    last_tile = num_tiles - 1

    def _absdiff(x_ref, t_ref):
        return jnp.abs(t_ref[...].astype(jnp.float32)
                       - x_ref[...].astype(jnp.float32))

    def _fold(vals, acc_ref):
        # Splits rows exactly at (8,128) vreg granularity -> layout-free
        # reshape + a chain of elementwise VPU adds into the resident block.
        acc_ref[...] += vals.reshape(sub_blocks, 8, LANE).sum(axis=0)

    def kernel(x_ref, t_ref, acc_ref):
        i = pl.program_id(1)  # reduction ("arbitrary") axis

        @pl.when(i == 0)
        def _init():
            acc_ref[...] = jnp.zeros_like(acc_ref)

        # Global tile index; overrun tiles of an uneven split are skipped.
        tile_idx = pl.program_id(0) * tiles_per_split + i

        if edge_valid_rows is None:
            # All tiles full: unmasked fast path.
            @pl.when(tile_idx < num_tiles)
            def _fast():
                _fold(_absdiff(x_ref, t_ref), acc_ref)
        else:
            # Interior tiles: unmasked fast path.
            @pl.when(tile_idx < last_tile)
            def _fast():
                _fold(_absdiff(x_ref, t_ref), acc_ref)

            # Final partial tile: rows >= edge_valid_rows are garbage (Pallas
            # does not zero-fill OOB block regions) -> mask only here.
            @pl.when(tile_idx == last_tile)
            def _edge():
                row_ids = jax.lax.broadcasted_iota(
                    jnp.int32, (tile_rows, LANE), 0)
                d = jnp.where(row_ids < edge_valid_rows,
                              _absdiff(x_ref, t_ref), 0.0)
                _fold(d, acc_ref)

    return kernel


def _abs_diff_sum_pallas(x_slab, t_slab):
    """sum(|t_slab - x_slab|) via a streaming Pallas reduction."""
    rows = x_slab.shape[0]
    sub = max(_sublane_multiple(x_slab.dtype), _sublane_multiple(t_slab.dtype))
    itemsize = max(jnp.dtype(x_slab.dtype).itemsize,
                   jnp.dtype(t_slab.dtype).itemsize)

    # Byte-sized tiles (~4 MiB / input block), rounded to the sublane multiple
    # and capped at the slab so block_shape never exceeds the array.
    max_tile_rows = max(sub, _round_down(TILE_BYTES // (LANE * itemsize), sub))
    tile_rows = min(max_tile_rows, _round_down(rows, sub))

    num_tiles = pl.cdiv(rows, tile_rows)
    num_splits = min(MAX_SPLITS, num_tiles)   # degenerate-shape guard
    tiles_per_split = pl.cdiv(num_tiles, num_splits)

    rem = rows % tile_rows
    edge_valid_rows = rem if rem != 0 else None

    last_tile = num_tiles - 1

    def in_map(p, i):
        # Clamp so overrun tiles re-read an in-bounds block; their compute is
        # skipped by pl.when in the kernel.
        return (jnp.minimum(p * tiles_per_split + i, last_tile), 0)

    in_spec = pl.BlockSpec((tile_rows, LANE), in_map)
    # One resident (8,128) accumulator block per parallel split.
    out_spec = pl.BlockSpec((None, 8, LANE), lambda p, i: (p, 0, 0))

    kernel = _make_abs_sum_kernel(tile_rows, tiles_per_split, num_tiles,
                                  edge_valid_rows)

    n_elems = int(x_slab.size)
    bytes_accessed = int(x_slab.size) * int(jnp.dtype(x_slab.dtype).itemsize) \
        + int(t_slab.size) * int(jnp.dtype(t_slab.dtype).itemsize) \
        + num_splits * 8 * LANE * 4

    partials = pl.pallas_call(
        kernel,
        out_shape=jax.ShapeDtypeStruct((num_splits, 8, LANE), jnp.float32),
        grid=(num_splits, tiles_per_split),
        in_specs=[in_spec, in_spec],
        out_specs=out_spec,
        compiler_params=pltpu.CompilerParams(
            # TODO(synk): verify axis 0 actually shards across v7x's two
            # TensorCores; if serialized, switch to pltpu.CORE_PARALLEL.
            dimension_semantics=("parallel", "arbitrary"),
            vmem_limit_bytes=VMEM_LIMIT_BYTES,
        ),
        cost_estimate=pl.CostEstimate(
            flops=3 * n_elems,
            transcendentals=0,
            bytes_accessed=bytes_accessed,
        ),
    )(x_slab, t_slab)

    # Tiny final cross-lane reduction (num_splits * 8 * 128 elements).
    return jnp.sum(partials)


def loss_for_backbone(inp, target, user_defined_value, *,
                      min_pallas_bytes=MIN_PALLAS_BYTES):
    """Pallas implementation of LossForBackbone.forward:
       mean(|target - inp|) * mean(user_defined_value)."""
    n_x = int(inp.size)

    # mean(u) is independent of the elementwise loss; compute it wrapper-side
    # (a tiny / arbitrary-shape reduction) so the streaming kernel is 2-input.
    mean_u = jnp.mean(user_defined_value.astype(jnp.float32))

    in_bytes = n_x * int(jnp.dtype(inp.dtype).itemsize)
    rows = pl.cdiv(n_x, LANE)
    sub = max(_sublane_multiple(inp.dtype), _sublane_multiple(target.dtype))

    if in_bytes < min_pallas_bytes or rows < sub:
        # Tiny inputs: pad + launch overhead dwarfs the work; plain jnp wins.
        abs_sum = jnp.sum(jnp.abs(target.astype(jnp.float32)
                                  - inp.astype(jnp.float32)))
    else:
        abs_sum = _abs_diff_sum_pallas(_to_slab(inp), _to_slab(target))

    return (abs_sum / n_x) * mean_u


if __name__ == "__main__":
    key = jax.random.PRNGKey(0)

    def _ref(x, t, u):
        return jnp.mean(jnp.abs(t - x) * jnp.mean(u))

    # Case 1: small NCHW tensors consistent with the module's forward.
    # Forced through the Pallas path (single full tile, single split).
    k1, k2, k3 = jax.random.split(key, 3)
    inp = jax.random.normal(k1, (2, 4, 16, 16), dtype=jnp.float32)
    target = jax.random.normal(k2, (2, 4, 16, 16), dtype=jnp.float32)
    udv = jax.random.uniform(k3, (2, 4, 16, 16), dtype=jnp.float32)

    loss = jax.block_until_ready(
        loss_for_backbone(inp, target, udv, min_pallas_bytes=0))
    ref = _ref(inp, target, udv)
    assert jnp.allclose(loss, ref, rtol=1e-5, atol=1e-6), (loss, ref)

    # Case 2: shape whose row count is not a multiple of the tile size ->
    # exercises the two-way split and the masked boundary-tile path.
    k4, k5, k6 = jax.random.split(jax.random.PRNGKey(1), 3)
    inp2 = jax.random.normal(k4, (3, 4, 20, 16), dtype=jnp.float32)
    target2 = jax.random.normal(k5, (3, 4, 20, 16), dtype=jnp.float32)
    udv2 = jax.random.uniform(k6, (7, 3), dtype=jnp.float32)

    loss2 = jax.block_until_ready(
        loss_for_backbone(inp2, target2, udv2, min_pallas_bytes=0))
    ref2 = _ref(inp2, target2, udv2)
    assert jnp.allclose(loss2, ref2, rtol=1e-5, atol=1e-6), (loss2, ref2)

    # Case 3: default call (tiny input -> plain-jnp fallback path).
    loss3 = jax.block_until_ready(loss_for_backbone(inp, target, udv))
    assert jnp.allclose(loss3, ref, rtol=1e-5, atol=1e-6), (loss3, ref)

    print("KERNEL_OK")
</pallas_src>

<mosaic_0001>
module attributes {stable_mosaic.version = 11 : i64} {
  func.func @kernel(%arg0: i32, %arg1: i32, %arg2: memref<16x128xf32, #tpu.memory_space<vmem>>, %arg3: memref<16x128xf32, #tpu.memory_space<vmem>>, %arg4: memref<1x8x128xf32, #tpu.memory_space<vmem>>) attributes {dimension_semantics = [#tpu.dimension_semantics<parallel>, #tpu.dimension_semantics<arbitrary>], iteration_bounds = array<i64: 1, 1>, scalar_prefetch = 0 : i64, scratch_operands = 0 : i64, tpu.core_type = #tpu.core_type<tc>, window_params = [{transform_indices = @transform_0, window_bounds = array<i64: 16, 128>}, {transform_indices = @transform_1, window_bounds = array<i64: 16, 128>}, {transform_indices = @transform_2, window_bounds = array<i64: 1, 8, 128>}]} {
    %c0_i32 = arith.constant 0 : i32
    %0 = arith.cmpi eq, %arg1, %c0_i32 : i32
    %1 = arith.extui %0 : i1 to i32
    %c0_i32_0 = arith.constant 0 : i32
    %2 = arith.cmpi ne, %1, %c0_i32_0 : i32
    scf.if %2 {
      %cst = arith.constant 0.000000e+00 : f32
      %8 = vector.broadcast %cst : f32 to vector<8x128xf32>
      %c0 = arith.constant 0 : index
      %c0_3 = arith.constant 0 : index
      %c0_4 = arith.constant 0 : index
      %9 = vector.load %arg4[%c0, %c0_3, %c0_4] : memref<1x8x128xf32, #tpu.memory_space<vmem>>, vector<1x8x128xf32>
      %10 = vector.shape_cast %9 : vector<1x8x128xf32> to vector<8x128xf32>
      %11 = vector.shape_cast %8 : vector<8x128xf32> to vector<1x8x128xf32>
      tpu.vector_store %arg4[%c0, %c0_3, %c0_4], %11 {strides = array<i32>} : memref<1x8x128xf32, #tpu.memory_space<vmem>>, vector<1x8x128xf32>,
    } else {
    }
    %c1_i32 = arith.constant 1 : i32
    %3 = arith.muli %arg0, %c1_i32 : i32
    %4 = arith.addi %3, %arg1 : i32
    %c1_i32_1 = arith.constant 1 : i32
    %5 = arith.cmpi slt, %4, %c1_i32_1 : i32
    %6 = arith.extui %5 : i1 to i32
    %c0_i32_2 = arith.constant 0 : i32
    %7 = arith.cmpi ne, %6, %c0_i32_2 : i32
    scf.if %7 {
      %c0 = arith.constant 0 : index
      %c0_3 = arith.constant 0 : index
      %8 = vector.load %arg3[%c0, %c0_3] : memref<16x128xf32, #tpu.memory_space<vmem>>, vector<16x128xf32>
      %c0_4 = arith.constant 0 : index
      %c0_5 = arith.constant 0 : index
      %9 = vector.load %arg2[%c0_4, %c0_5] : memref<16x128xf32, #tpu.memory_space<vmem>>, vector<16x128xf32>
      %10 = arith.subf %8, %9 : vector<16x128xf32>
      %11 = math.absf %10 : vector<16x128xf32>
      %c0_6 = arith.constant 0 : index
      %c0_7 = arith.constant 0 : index
      %c0_8 = arith.constant 0 : index
      %12 = vector.load %arg4[%c0_6, %c0_7, %c0_8] : memref<1x8x128xf32, #tpu.memory_space<vmem>>, vector<1x8x128xf32>
      %13 = vector.shape_cast %12 : vector<1x8x128xf32> to vector<8x128xf32>
      %14 = vector.shape_cast %11 : vector<16x128xf32> to vector<2x8x128xf32>
      %cst = arith.constant dense<0.000000e+00> : vector<8x128xf32>
      %15 = vector.multi_reduction <add>, %14, %cst [0] : vector<2x8x128xf32> to vector<8x128xf32>
      %16 = arith.addf %13, %15 : vector<8x128xf32>
      %c0_9 = arith.constant 0 : index
      %c0_10 = arith.constant 0 : index
      %c0_11 = arith.constant 0 : index
      %17 = vector.load %arg4[%c0_9, %c0_10, %c0_11] : memref<1x8x128xf32, #tpu.memory_space<vmem>>, vector<1x8x128xf32>
      %18 = vector.shape_cast %17 : vector<1x8x128xf32> to vector<8x128xf32>
      %19 = vector.shape_cast %16 : vector<8x128xf32> to vector<1x8x128xf32>
      tpu.vector_store %arg4[%c0_9, %c0_10, %c0_11], %19 {strides = array<i32>} : memref<1x8x128xf32, #tpu.memory_space<vmem>>, vector<1x8x128xf32>,
    } else {
    }
    return
  }
  func.func @transform_0(%arg0: i32, %arg1: i32) -> (i32, i32) {
    %c1_i32 = arith.constant 1 : i32
    %0 = arith.muli %arg0, %c1_i32 : i32
    %1 = arith.addi %0, %arg1 : i32
    %c0_i32 = arith.constant 0 : i32
    %2 = arith.minsi %1, %c0_i32 : i32
    %c0_i32_0 = arith.constant 0 : i32
    %c0_i32_1 = arith.constant 0 : i32
    return %2, %c0_i32_0 : i32, i32
  }
  func.func @transform_1(%arg0: i32, %arg1: i32) -> (i32, i32) {
    %c1_i32 = arith.constant 1 : i32
    %0 = arith.muli %arg0, %c1_i32 : i32
    %1 = arith.addi %0, %arg1 : i32
    %c0_i32 = arith.constant 0 : i32
    %2 = arith.minsi %1, %c0_i32 : i32
    %c0_i32_0 = arith.constant 0 : i32
    %c0_i32_1 = arith.constant 0 : i32
    return %2, %c0_i32_0 : i32, i32
  }
  func.func @transform_2(%arg0: i32, %arg1: i32) -> (i32, i32, i32) {
    %c0_i32 = arith.constant 0 : i32
    %c0_i32_0 = arith.constant 0 : i32
    %c0_i32_1 = arith.constant 0 : i32
    return %arg0, %c0_i32, %c0_i32_0 : i32, i32, i32
  }
}

</mosaic_0001>

<bundles_post_ra>
// kernel: tpu_custom_call.1
= control target key start
LH: loop header
LB: loop body
LE: loop exit
PB: predicated region body
PF: predicated region fallthrough
CT: control target
= control target key end

     0   :  { %7 = vsyncpa [#allocation3], 0  ;;  %s236_s0 = inlined_call_operand.hbm [shape: f32[16,128], index: 0, kind: input, shape index: {}]   ;;  %s237_s1 = inlined_call_operand.hbm [shape: f32[16,128], index: 1, kind: input, shape index: {}]   ;;  %s238_s2 = inlined_call_operand.hbm [shape: f32[1,8,128], index: 2, kind: output, shape index: {}]  }
   0x1   :  { %8 = vsyncpa [#allocation6], 0 }
   0x2   :  { %9 = vsyncpa [#allocation4], 0  ;;  %s180_s9 = smov [#allocation2]   ;;  %s108_s13 = scalar_lea.hbm %s236_s0, 256 }
   0x3   :  { %s21_s10 = sshll.u32 %s180_s9, 4  ;;  %p109_p0 = scmp.ne.s32.totalorder %s236_s0, %s108_s13  ;;  %s22_s10 = int_to_ptr.vmem [resolvable:$true] %s21_s10 }
   0x4   :  { %p112_p1 = scmp.lt.u32.totalorder %s108_s13, %s236_s0 }
   0x6   :  { %p114_p2 = pnand %p112_p1, %p109_p0 }
   0x8   :  { %117 = shalt.err (!%p114_p2)
}
   0x9   :  { %s118_s18 = scalar_lea.vmem %s22_s10, 256  ;;  %p123_p4 = scmp.lt.s32.totalorder %s22_s10, %s22_s10 }
   0xa   :  { %p119_p3 = scmp.ne.s32.totalorder %s22_s10, %s118_s18  ;;  %p124_p5 = scmp.lt.s32.totalorder %s118_s18, %s118_s18 }
   0xc   :  { %p125_p6 = por %p124_p5, %p123_p4 }
   0xe   :  { %p126_p7 = pnand %p125_p6, %p119_p3 }
  0x10   :  { %129 = shalt.err (!%p126_p7)
}
  0x11   :  { %s181_s19 = smov 128   ;;  %s182_s20 = smov 8  }
  0x12   :  { %27 = dma.hbm_to_vmem [thread:$0]  %s236_s0, 256, %s22_s10, [#allocation3], %s181_s19, %s181_s19, %s182_s20  }
  0x13   :  { %s183_s23 = smov [#allocation5]   ;;  %s130_s27 = scalar_lea.hbm %s237_s1, 256 }
  0x14   :  { %s39_s24 = sshll.u32 %s183_s23, 4  ;;  %p131_p8 = scmp.ne.s32.totalorder %s237_s1, %s130_s27  ;;  %s40_s24 = int_to_ptr.vmem [resolvable:$true] %s39_s24 }
  0x15   :  { %p134_p9 = scmp.lt.u32.totalorder %s130_s27, %s237_s1 }
  0x17   :  { %p136_p10 = pnand %p134_p9, %p131_p8 }
  0x19   :  { %139 = shalt.err (!%p136_p10)
}
  0x1a   :  { %s140_s4 = scalar_lea.vmem %s40_s24, 256  ;;  %p145_p12 = scmp.lt.s32.totalorder %s40_s24, %s40_s24 }
  0x1b   :  { %p141_p11 = scmp.ne.s32.totalorder %s40_s24, %s140_s4  ;;  %p146_p13 = scmp.lt.s32.totalorder %s140_s4, %s140_s4 }
  0x1d   :  { %p147_p0 = por %p146_p13, %p145_p12 }
  0x1f   :  { %p148_p1 = pnand %p147_p0, %p141_p11 }
  0x21   :  { %151 = shalt.err (!%p148_p1)
}
  0x22   :  { %45 = dma.hbm_to_vmem [thread:$0]  %s237_s1, 256, %s40_s24, [#allocation6], %s181_s19, %s181_s19, %s182_s20  }
  0x23   :  { %174 = dma.done.wait [#allocation3], 256  }
  0x24   :  { %175 = vsyncadd [#allocation3], 4294967040 }
  0x25   :  { %176 = dma.done.wait [#allocation6], 256  }
  0x26   :  { %177 = vsyncadd [#allocation6], 4294967040  ;;  %v70_v0 = vld [vmem:[#allocation5] sm:$0xff]  ;;  %v71_v1 = vld [vmem:[#allocation5 + $0x8] sm:$0xff]  ;;  %s184_s6 = smov [#allocation7]  }
  0x27   :  { %v72_v2 = vld [vmem:[#allocation2] sm:$0xff]  ;;  %v73_v3 = vld [vmem:[#allocation2 + $0x8] sm:$0xff]  ;;  %s88_s7 = sshll.u32 %s184_s6, 4  ;;  %s89_s7 = int_to_ptr.vmem [resolvable:$true] %s88_s7 }
  0x28   :  { %v74_v4 = vsub.f32 %v70_v0, %v72_v2  ;;  %v75_v5 = vsub.f32 %v71_v1, %v73_v3  ;;  %s152_s8 = scalar_lea.vmem %s89_s7, 128  ;;  %p157_p3 = scmp.lt.s32.totalorder %s89_s7, %s89_s7 }
  0x29   :  { %p153_p2 = scmp.ne.s32.totalorder %s89_s7, %s152_s8  ;;  %p158_p4 = scmp.lt.s32.totalorder %s152_s8, %s152_s8 }
  0x2a   :  { %v76_v6 = vand.u32 2147483647, %v74_v4  ;;  %v77_v7 = vand.u32 2147483647, %v75_v5 }
  0x2b   :  { %p159_p5 = por %p158_p4, %p157_p3 }
  0x2c   :  { %v79_v8 = vadd.f32 %v77_v7, %v76_v6 }
  0x2d   :  { %p160_p6 = pnand %p159_p5, %p153_p2 }
  0x2e   :  { %81 = vst [vmem:[#allocation7] sm:$0xff] %v79_v8 }
  0x2f   :  { %163 = shalt.err (!%p160_p6)
}
  0x30   :  { %s164_s10 = scalar_lea.hbm %s238_s2, 128 }
  0x31   :  { %p165_p7 = scmp.ne.s32.totalorder %s238_s2, %s164_s10  ;;  %p168_p8 = scmp.lt.u32.totalorder %s164_s10, %s238_s2 }
  0x33   :  { %p170_p9 = pnand %p168_p8, %p165_p7 }
  0x35   :  { %173 = shalt.err (!%p170_p9)
}
  0x36   :  { %91 = dma.vmem_to_hbm [thread:$0]  %s89_s7, 128, %s238_s2, [#allocation4]  }
  0x37   :  { %178 = dma.done.wait [#allocation4], 128  }
  0x38   :  { %179 = vsyncadd [#allocation4], 4294967168 }
  0x39   :  { %95 = vsyncpa [#allocation3], 1 }
  0x3a   :  { %96 = vsyncpa [#allocation6], 1 }
  0x3b   :  { %97 = vsyncpa [#allocation4], 1 }

</bundles_post_ra>
